<compile_context>
chip_gen: v5e
topology: v5e:2x2
jax: 0.10.0
libtpu: 0.0.40
codegen_flags: <defaults>
</compile_context>

<pallas_src>
import jax
import jax.numpy as jnp
from jax import lax
from jax.experimental import pallas as pl
from jax.experimental.pallas import tpu as pltpu


_MXU_DTYPE = jnp.bfloat16   # MXU operand dtype (f32 accumulation everywhere)


def _pool2x2(x):
    """(R, 2, Wp, 2C) bf16 -> (R, Wp, C) bf16: 2x2 SUM (0.25 folded in weights)."""
    rs = x[:, 0, :, :] + x[:, 1, :, :]          # row pair
    c = rs.shape[-1] // 2
    return rs[:, :, :c] + rs[:, :, c:]          # column pair (lane halves)


# ---------------------------------------------------------------------------
# fused kernel: 2x2 average pool -> 3x3 same conv (no bias), one H tile
# ---------------------------------------------------------------------------
def _pool_conv_kernel(xc_ref, xt_ref, xb_ref, w_ref, o_ref, pad_ref):
    """
    xc_ref:  (TH, 2, Wp, 2*C) bf16  centre rows of this tile (pre-pool)
    xt_ref:  (1, 2, Wp, 2*C)  bf16  pooled-row halo above (clamped at border)
    xb_ref:  (1, 2, Wp, 2*C)  bf16  pooled-row halo below (clamped at border)
    w_ref:   (3, 3*C, Cout)   bf16  per-ky weights, kx taps merged on K
    o_ref:   (TH, Wp, Cout)   f32
    pad_ref: (TH+2, Wp, C)    bf16  H-padded pooled strip (VMEM scratch)
    """
    TH, _, Wp, C2 = xc_ref.shape
    C = C2 // 2

    t = pl.program_id(1)
    n_t = pl.num_programs(1)

    # ---- 2x2 pool straight into the H-padded strip --------------------------
    # Halo rows double as the conv's zero padding at the image borders
    # (0/1 scalar mask).  Only these two rows are ever "zeroed"; the interior
    # is fully overwritten every step (no full-scratch memset).
    pad_ref[1:TH + 1, :, :] = _pool2x2(xc_ref[...])
    top_valid = (t > 0).astype(pad_ref.dtype)
    bot_valid = (t < n_t - 1).astype(pad_ref.dtype)
    pad_ref[0:1, :, :] = _pool2x2(xt_ref[...]) * top_valid
    pad_ref[TH + 1:TH + 2, :, :] = _pool2x2(xb_ref[...]) * bot_valid

    # ---- W-direction taps: shift the whole strip once per direction ---------
    # (zero edge column built in, so no separate mask is needed)
    P = pad_ref[...]                                        # (TH+2, Wp, C)
    zcol = jnp.zeros((TH + 2, 1, C), P.dtype)
    PL = jnp.concatenate([zcol, P[:, :Wp - 1, :]], axis=1)  # PL[:, w] = P[:, w-1]
    PR = jnp.concatenate([P[:, 1:, :], zcol], axis=1)       # PR[:, w] = P[:, w+1]

    # ---- 3x3 conv as 3 MXU matmuls with K = 3*C, accumulated in o_ref -------
    Cout = o_ref.shape[-1]
    for ky in range(3):
        op = jnp.concatenate(
            [PL[ky:ky + TH], P[ky:ky + TH], PR[ky:ky + TH]], axis=-1)  # (TH,Wp,3C)
        d = jnp.dot(op.reshape(TH * Wp, 3 * C), w_ref[ky],
                    preferred_element_type=jnp.float32)
        d = d.reshape(TH, Wp, Cout)
        if ky == 0:
            o_ref[...] = d
        else:
            o_ref[...] += d


# ---------------------------------------------------------------------------
# tiling / VMEM heuristics
# ---------------------------------------------------------------------------
def _vmem_est(th, Wp, C, Cout):
    """Rough per-grid-step VMEM bytes (pipelined blocks + scratch + temps)."""
    bf = 2
    cin = th * 2 * Wp * 2 * C * bf               # centre input block (bf16)
    hin = 2 * (2 * Wp * 2 * C) * bf              # two 1-row halo blocks
    wgt = 9 * C * Cout * bf                      # merged-tap weights
    outb = th * Wp * Cout * 4                    # f32 output block
    pad = (th + 2) * Wp * C * bf                 # H-padded pooled strip
    tmp = 3 * pad + 3 * th * Wp * 3 * C * bf + outb   # PL/PR, per-ky operand, acc
    return 2 * (cin + hin + wgt + outb) + pad + tmp


def _choose_tile_h(Hp, Wp, C, Cout, budget):
    """Largest divisor of Hp whose per-step VMEM fits the budget."""
    divs = [d for d in range(1, Hp + 1) if Hp % d == 0]
    for th in sorted(divs, reverse=True):
        if _vmem_est(th, Wp, C, Cout) <= budget:
            return th
    big_enough = [d for d in divs if d >= 8]     # keep halo overhead <= 25%
    return min(big_enough) if big_enough else max(divs)


# ---------------------------------------------------------------------------
# wrapper: NCHW in / NCHW out (matches the PyTorch module interface)
# ---------------------------------------------------------------------------
def downsample_forward(x_nchw, conv_w, *, tile_h=None):
    """x_nchw: (B, C, H, W) float32;  conv_w: (2C, C, 3, 3) torch OIHW layout."""
    B, C, H, W = x_nchw.shape
    Cout = conv_w.shape[0]
    assert H % 2 == 0 and W % 2 == 0, "even spatial dims required"
    # TODO(synk): odd H/W needs true bilinear edge taps; fftformer feature maps
    # stay even so the exact 2x2-average equivalence applies.
    Hp, Wp = H // 2, W // 2

    # Layout plumbing: one fused XLA transpose+cast (NCHW f32 -> NHWC bf16),
    # then a FREE row-major reshape that puts the 2x2-pool partners adjacently
    # (row pairs on axis 1, column pairs on the 2*C lane axis).
    x = jnp.transpose(x_nchw, (0, 2, 3, 1)).astype(_MXU_DTYPE)
    xr = x.reshape(B * Hp, 2, Wp, 2 * C)

    # Torch OIHW -> (ky, kx*Cin + cin, cout); fold the 0.25 pool scale (f32),
    # then cast to bf16 for the MXU.
    w3 = jnp.transpose(conv_w.astype(jnp.float32), (2, 3, 1, 0))   # (3,3,Cin,Cout)
    w3 = (0.25 * w3).reshape(3, 3 * C, Cout).astype(_MXU_DTYPE)

    if tile_h is None:
        tile_h = _choose_tile_h(Hp, Wp, C, Cout, budget=12 << 20)
    TH = int(tile_h)
    assert Hp % TH == 0
    n_t = Hp // TH

    # Per-generation scoped-VMEM limit: always set it explicitly (v5e default
    # is only 16 MiB) and keep ~25% headroom below physical capacity (v7x has
    # only 64 MiB physical).
    est = _vmem_est(TH, Wp, C, Cout)
    try:
        phys = int(getattr(pltpu.get_tpu_info(), "vmem_capacity_bytes", 64 << 20))
    except Exception:
        phys = 64 << 20
    cap = (phys * 3) // 4
    vmem_limit = int(min(max(2 * est, 32 << 20), cap))
    # TODO(synk): if est exceeds cap at extreme Wp*C, add a W-tiled grid axis
    # with a 1-pooled-column halo as well.

    out3 = pl.pallas_call(
        _pool_conv_kernel,
        out_shape=jax.ShapeDtypeStruct((B * Hp, Wp, Cout), jnp.float32),
        grid_spec=pltpu.PrefetchScalarGridSpec(
            num_scalar_prefetch=0,
            grid=(B, n_t),
            in_specs=[
                # centre rows of this H tile
                pl.BlockSpec((TH, 2, Wp, 2 * C),
                             lambda b, t: (b * n_t + t, 0, 0, 0)),
                # 1-pooled-row halo above (clamped at the border, masked in-kernel)
                pl.BlockSpec((1, 2, Wp, 2 * C),
                             lambda b, t: (b * Hp + jnp.maximum(t * TH - 1, 0),
                                           0, 0, 0)),
                # 1-pooled-row halo below (clamped at the border, masked in-kernel)
                pl.BlockSpec((1, 2, Wp, 2 * C),
                             lambda b, t: (b * Hp + jnp.minimum((t + 1) * TH, Hp - 1),
                                           0, 0, 0)),
                # merged-tap weights (resident)
                pl.BlockSpec((3, 3 * C, Cout), lambda b, t: (0, 0, 0)),
            ],
            out_specs=pl.BlockSpec((TH, Wp, Cout),
                                   lambda b, t: (b * n_t + t, 0, 0)),
            scratch_shapes=[pltpu.VMEM((TH + 2, Wp, C), _MXU_DTYPE)],
        ),
        compiler_params=pltpu.CompilerParams(
            dimension_semantics=("parallel", "parallel"),
            vmem_limit_bytes=vmem_limit),
    )(xr, xr, xr, w3)

    out = out3.reshape(B, Hp, Wp, Cout)          # free reshape
    return jnp.transpose(out, (0, 3, 1, 2))      # back to NCHW


# ---------------------------------------------------------------------------
# pure-JAX reference (correctness check against the fused kernel)
# ---------------------------------------------------------------------------
def _reference(x_nchw, conv_w):
    B, C, H, W = x_nchw.shape
    pooled = x_nchw.reshape(B, C, H // 2, 2, W // 2, 2).mean(axis=(3, 5))
    return lax.conv_general_dilated(
        pooled, conv_w, window_strides=(1, 1), padding=((1, 1), (1, 1)),
        dimension_numbers=("NCHW", "OIHW", "NCHW"))


if __name__ == "__main__":
    key = jax.random.PRNGKey(0)
    k_x, k_w = jax.random.split(key)
    B, n_feat, H, W = 2, 4, 16, 16
    x = jax.random.normal(k_x, (B, n_feat, H, W), dtype=jnp.float32)        # NCHW
    conv_w = 0.1 * jax.random.normal(k_w, (2 * n_feat, n_feat, 3, 3),
                                     dtype=jnp.float32)                     # OIHW

    fwd = jax.jit(lambda inp: downsample_forward(inp, conv_w))
    out = fwd(x)
    jax.block_until_ready(out)
    assert out.shape == (B, 2 * n_feat, H // 2, W // 2)
    assert out.dtype == jnp.float32

    ref = _reference(x, conv_w)
    err = float(jnp.max(jnp.abs(out - ref)))
    assert err < 5e-2, f"max abs error vs reference too large: {err}"
    print("KERNEL_OK")
</pallas_src>

<mosaic_0001>
module attributes {stable_mosaic.version = 11 : i64} {
  func.func @_pool_conv_kernel(%arg0: i32, %arg1: i32, %arg2: memref<8x2x8x8xbf16, #tpu.memory_space<vmem>>, %arg3: memref<1x2x8x8xbf16, #tpu.memory_space<vmem>>, %arg4: memref<1x2x8x8xbf16, #tpu.memory_space<vmem>>, %arg5: memref<3x12x8xbf16, #tpu.memory_space<vmem>>, %arg6: memref<8x8x8xf32, #tpu.memory_space<vmem>>, %arg7: memref<10x8x4xbf16, #tpu.memory_space<vmem>>) attributes {dimension_semantics = [#tpu.dimension_semantics<parallel>, #tpu.dimension_semantics<parallel>], iteration_bounds = array<i64: 2, 1>, scalar_prefetch = 0 : i64, scratch_operands = 1 : i64, tpu.core_type = #tpu.core_type<tc>, window_params = [{transform_indices = @transform_0, window_bounds = array<i64: 8, 2, 8, 8>}, {transform_indices = @transform_1, window_bounds = array<i64: 1, 2, 8, 8>}, {transform_indices = @transform_2, window_bounds = array<i64: 1, 2, 8, 8>}, {pipeline_mode = #tpu.pipeline_mode<synchronous>, transform_indices = @transform_3, window_bounds = array<i64: 3, 12, 8>}, {transform_indices = @transform_4, window_bounds = array<i64: 8, 8, 8>}]} {
    %c0 = arith.constant 0 : index
    %c0_0 = arith.constant 0 : index
    %c0_1 = arith.constant 0 : index
    %c0_2 = arith.constant 0 : index
    %0 = vector.load %arg2[%c0, %c0_0, %c0_1, %c0_2] : memref<8x2x8x8xbf16, #tpu.memory_space<vmem>>, vector<8x2x8x8xbf16>
    %1 = vector.extract_strided_slice %0 {offsets = [0, 0, 0, 0], sizes = [8, 1, 8, 8], strides = [1, 1, 1, 1]} : vector<8x2x8x8xbf16> to vector<8x1x8x8xbf16>
    %2 = vector.shape_cast %1 : vector<8x1x8x8xbf16> to vector<8x8x8xbf16>
    %3 = vector.extract_strided_slice %0 {offsets = [0, 1, 0, 0], sizes = [8, 1, 8, 8], strides = [1, 1, 1, 1]} : vector<8x2x8x8xbf16> to vector<8x1x8x8xbf16>
    %4 = vector.shape_cast %3 : vector<8x1x8x8xbf16> to vector<8x8x8xbf16>
    %5 = arith.addf %2, %4 : vector<8x8x8xbf16>
    %6 = vector.extract_strided_slice %5 {offsets = [0, 0, 0], sizes = [8, 8, 4], strides = [1, 1, 1]} : vector<8x8x8xbf16> to vector<8x8x4xbf16>
    %7 = vector.extract_strided_slice %5 {offsets = [0, 0, 4], sizes = [8, 8, 4], strides = [1, 1, 1]} : vector<8x8x8xbf16> to vector<8x8x4xbf16>
    %8 = arith.addf %6, %7 : vector<8x8x4xbf16>
    %c1 = arith.constant 1 : index
    %c0_3 = arith.constant 0 : index
    %c0_4 = arith.constant 0 : index
    %9 = vector.load %arg7[%c1, %c0_3, %c0_4] : memref<10x8x4xbf16, #tpu.memory_space<vmem>>, vector<8x8x4xbf16>
    tpu.vector_store %arg7[%c1, %c0_3, %c0_4], %8 {strides = array<i32>} : memref<10x8x4xbf16, #tpu.memory_space<vmem>>, vector<8x8x4xbf16>,
    %c0_i32 = arith.constant 0 : i32
    %10 = arith.cmpi sgt, %arg1, %c0_i32 : i32
    %11 = arith.extui %10 : i1 to i32
    %12 = arith.sitofp %11 : i32 to f32
    %13 = arith.truncf %12 : f32 to bf16
    %c0_i32_5 = arith.constant 0 : i32
    %14 = arith.cmpi slt, %arg1, %c0_i32_5 : i32
    %15 = arith.extui %14 : i1 to i32
    %16 = arith.sitofp %15 : i32 to f32
    %17 = arith.truncf %16 : f32 to bf16
    %c0_6 = arith.constant 0 : index
    %c0_7 = arith.constant 0 : index
    %c0_8 = arith.constant 0 : index
    %c0_9 = arith.constant 0 : index
    %18 = vector.load %arg3[%c0_6, %c0_7, %c0_8, %c0_9] : memref<1x2x8x8xbf16, #tpu.memory_space<vmem>>, vector<1x2x8x8xbf16>
    %19 = vector.extract_strided_slice %18 {offsets = [0, 0, 0, 0], sizes = [1, 1, 8, 8], strides = [1, 1, 1, 1]} : vector<1x2x8x8xbf16> to vector<1x1x8x8xbf16>
    %20 = vector.shape_cast %19 : vector<1x1x8x8xbf16> to vector<1x8x8xbf16>
    %21 = vector.extract_strided_slice %18 {offsets = [0, 1, 0, 0], sizes = [1, 1, 8, 8], strides = [1, 1, 1, 1]} : vector<1x2x8x8xbf16> to vector<1x1x8x8xbf16>
    %22 = vector.shape_cast %21 : vector<1x1x8x8xbf16> to vector<1x8x8xbf16>
    %23 = arith.addf %20, %22 : vector<1x8x8xbf16>
    %24 = vector.extract_strided_slice %23 {offsets = [0, 0, 0], sizes = [1, 8, 4], strides = [1, 1, 1]} : vector<1x8x8xbf16> to vector<1x8x4xbf16>
    %25 = vector.extract_strided_slice %23 {offsets = [0, 0, 4], sizes = [1, 8, 4], strides = [1, 1, 1]} : vector<1x8x8xbf16> to vector<1x8x4xbf16>
    %26 = arith.addf %24, %25 : vector<1x8x4xbf16>
    %27 = vector.broadcast %13 : bf16 to vector<1x8x4xbf16>
    %28 = arith.mulf %26, %27 : vector<1x8x4xbf16>
    %c0_10 = arith.constant 0 : index
    %c0_11 = arith.constant 0 : index
    %c0_12 = arith.constant 0 : index
    %29 = vector.load %arg7[%c0_10, %c0_11, %c0_12] : memref<10x8x4xbf16, #tpu.memory_space<vmem>>, vector<1x8x4xbf16>
    tpu.vector_store %arg7[%c0_10, %c0_11, %c0_12], %28 {strides = array<i32>} : memref<10x8x4xbf16, #tpu.memory_space<vmem>>, vector<1x8x4xbf16>,
    %c0_13 = arith.constant 0 : index
    %c0_14 = arith.constant 0 : index
    %c0_15 = arith.constant 0 : index
    %c0_16 = arith.constant 0 : index
    %30 = vector.load %arg4[%c0_13, %c0_14, %c0_15, %c0_16] : memref<1x2x8x8xbf16, #tpu.memory_space<vmem>>, vector<1x2x8x8xbf16>
    %31 = vector.extract_strided_slice %30 {offsets = [0, 0, 0, 0], sizes = [1, 1, 8, 8], strides = [1, 1, 1, 1]} : vector<1x2x8x8xbf16> to vector<1x1x8x8xbf16>
    %32 = vector.shape_cast %31 : vector<1x1x8x8xbf16> to vector<1x8x8xbf16>
    %33 = vector.extract_strided_slice %30 {offsets = [0, 1, 0, 0], sizes = [1, 1, 8, 8], strides = [1, 1, 1, 1]} : vector<1x2x8x8xbf16> to vector<1x1x8x8xbf16>
    %34 = vector.shape_cast %33 : vector<1x1x8x8xbf16> to vector<1x8x8xbf16>
    %35 = arith.addf %32, %34 : vector<1x8x8xbf16>
    %36 = vector.extract_strided_slice %35 {offsets = [0, 0, 0], sizes = [1, 8, 4], strides = [1, 1, 1]} : vector<1x8x8xbf16> to vector<1x8x4xbf16>
    %37 = vector.extract_strided_slice %35 {offsets = [0, 0, 4], sizes = [1, 8, 4], strides = [1, 1, 1]} : vector<1x8x8xbf16> to vector<1x8x4xbf16>
    %38 = arith.addf %36, %37 : vector<1x8x4xbf16>
    %39 = vector.broadcast %17 : bf16 to vector<1x8x4xbf16>
    %40 = arith.mulf %38, %39 : vector<1x8x4xbf16>
    %c9 = arith.constant 9 : index
    %c0_17 = arith.constant 0 : index
    %c0_18 = arith.constant 0 : index
    %41 = vector.load %arg7[%c9, %c0_17, %c0_18] : memref<10x8x4xbf16, #tpu.memory_space<vmem>>, vector<1x8x4xbf16>
    tpu.vector_store %arg7[%c9, %c0_17, %c0_18], %40 {strides = array<i32>} : memref<10x8x4xbf16, #tpu.memory_space<vmem>>, vector<1x8x4xbf16>,
    %c0_19 = arith.constant 0 : index
    %c0_20 = arith.constant 0 : index
    %c0_21 = arith.constant 0 : index
    %42 = vector.load %arg7[%c0_19, %c0_20, %c0_21] : memref<10x8x4xbf16, #tpu.memory_space<vmem>>, vector<10x8x4xbf16>
    %cst = arith.constant 0.000000e+00 : bf16
    %43 = vector.broadcast %cst : bf16 to vector<10x1x4xbf16>
    %44 = vector.extract_strided_slice %42 {offsets = [0, 0, 0], sizes = [10, 7, 4], strides = [1, 1, 1]} : vector<10x8x4xbf16> to vector<10x7x4xbf16>
    %45 = tpu.concatenate %43, %44 in 1 : vector<10x1x4xbf16>, vector<10x7x4xbf16> -> vector<10x8x4xbf16>
    %46 = vector.extract_strided_slice %42 {offsets = [0, 1, 0], sizes = [10, 7, 4], strides = [1, 1, 1]} : vector<10x8x4xbf16> to vector<10x7x4xbf16>
    %47 = tpu.concatenate %46, %43 in 1 : vector<10x7x4xbf16>, vector<10x1x4xbf16> -> vector<10x8x4xbf16>
    %48 = vector.extract_strided_slice %45 {offsets = [0, 0, 0], sizes = [8, 8, 4], strides = [1, 1, 1]} : vector<10x8x4xbf16> to vector<8x8x4xbf16>
    %49 = vector.extract_strided_slice %42 {offsets = [0, 0, 0], sizes = [8, 8, 4], strides = [1, 1, 1]} : vector<10x8x4xbf16> to vector<8x8x4xbf16>
    %50 = vector.extract_strided_slice %47 {offsets = [0, 0, 0], sizes = [8, 8, 4], strides = [1, 1, 1]} : vector<10x8x4xbf16> to vector<8x8x4xbf16>
    %51 = tpu.concatenate %48, %49, %50 in 2 : vector<8x8x4xbf16>, vector<8x8x4xbf16>, vector<8x8x4xbf16> -> vector<8x8x12xbf16>
    %52 = vector.shape_cast %51 : vector<8x8x12xbf16> to vector<64x12xbf16>
    %c0_22 = arith.constant 0 : index
    %c0_23 = arith.constant 0 : index
    %c0_24 = arith.constant 0 : index
    %53 = vector.load %arg5[%c0_22, %c0_23, %c0_24] : memref<3x12x8xbf16, #tpu.memory_space<vmem>>, vector<1x12x8xbf16>
    %54 = vector.shape_cast %53 : vector<1x12x8xbf16> to vector<12x8xbf16>
    %cst_25 = arith.constant dense<0.000000e+00> : vector<64x8xf32>
    %55 = tpu.matmul %52, %54, %cst_25 {dimension_numbers = #tpu.dot_dimension_numbers<[1], [0], [0], [1], [0, 0, 1, 1], [], []>} : vector<64x12xbf16>, vector<12x8xbf16>, vector<64x8xf32> -> vector<64x8xf32>
    %56 = vector.shape_cast %55 : vector<64x8xf32> to vector<8x8x8xf32>
    %c0_26 = arith.constant 0 : index
    %c0_27 = arith.constant 0 : index
    %c0_28 = arith.constant 0 : index
    %57 = vector.load %arg6[%c0_26, %c0_27, %c0_28] : memref<8x8x8xf32, #tpu.memory_space<vmem>>, vector<8x8x8xf32>
    tpu.vector_store %arg6[%c0_26, %c0_27, %c0_28], %56 {strides = array<i32>} : memref<8x8x8xf32, #tpu.memory_space<vmem>>, vector<8x8x8xf32>,
    %58 = vector.extract_strided_slice %45 {offsets = [1, 0, 0], sizes = [8, 8, 4], strides = [1, 1, 1]} : vector<10x8x4xbf16> to vector<8x8x4xbf16>
    %59 = vector.extract_strided_slice %42 {offsets = [1, 0, 0], sizes = [8, 8, 4], strides = [1, 1, 1]} : vector<10x8x4xbf16> to vector<8x8x4xbf16>
    %60 = vector.extract_strided_slice %47 {offsets = [1, 0, 0], sizes = [8, 8, 4], strides = [1, 1, 1]} : vector<10x8x4xbf16> to vector<8x8x4xbf16>
    %61 = tpu.concatenate %58, %59, %60 in 2 : vector<8x8x4xbf16>, vector<8x8x4xbf16>, vector<8x8x4xbf16> -> vector<8x8x12xbf16>
    %62 = vector.shape_cast %61 : vector<8x8x12xbf16> to vector<64x12xbf16>
    %c1_29 = arith.constant 1 : index
    %c0_30 = arith.constant 0 : index
    %c0_31 = arith.constant 0 : index
    %63 = vector.load %arg5[%c1_29, %c0_30, %c0_31] : memref<3x12x8xbf16, #tpu.memory_space<vmem>>, vector<1x12x8xbf16>
    %64 = vector.shape_cast %63 : vector<1x12x8xbf16> to vector<12x8xbf16>
    %cst_32 = arith.constant dense<0.000000e+00> : vector<64x8xf32>
    %65 = tpu.matmul %62, %64, %cst_32 {dimension_numbers = #tpu.dot_dimension_numbers<[1], [0], [0], [1], [0, 0, 1, 1], [], []>} : vector<64x12xbf16>, vector<12x8xbf16>, vector<64x8xf32> -> vector<64x8xf32>
    %66 = vector.shape_cast %65 : vector<64x8xf32> to vector<8x8x8xf32>
    %c0_33 = arith.constant 0 : index
    %c0_34 = arith.constant 0 : index
    %c0_35 = arith.constant 0 : index
    %67 = vector.load %arg6[%c0_33, %c0_34, %c0_35] : memref<8x8x8xf32, #tpu.memory_space<vmem>>, vector<8x8x8xf32>
    %68 = arith.addf %67, %66 : vector<8x8x8xf32>
    %c0_36 = arith.constant 0 : index
    %c0_37 = arith.constant 0 : index
    %c0_38 = arith.constant 0 : index
    %69 = vector.load %arg6[%c0_36, %c0_37, %c0_38] : memref<8x8x8xf32, #tpu.memory_space<vmem>>, vector<8x8x8xf32>
    tpu.vector_store %arg6[%c0_36, %c0_37, %c0_38], %68 {strides = array<i32>} : memref<8x8x8xf32, #tpu.memory_space<vmem>>, vector<8x8x8xf32>,
    %70 = vector.extract_strided_slice %45 {offsets = [2, 0, 0], sizes = [8, 8, 4], strides = [1, 1, 1]} : vector<10x8x4xbf16> to vector<8x8x4xbf16>
    %71 = vector.extract_strided_slice %42 {offsets = [2, 0, 0], sizes = [8, 8, 4], strides = [1, 1, 1]} : vector<10x8x4xbf16> to vector<8x8x4xbf16>
    %72 = vector.extract_strided_slice %47 {offsets = [2, 0, 0], sizes = [8, 8, 4], strides = [1, 1, 1]} : vector<10x8x4xbf16> to vector<8x8x4xbf16>
    %73 = tpu.concatenate %70, %71, %72 in 2 : vector<8x8x4xbf16>, vector<8x8x4xbf16>, vector<8x8x4xbf16> -> vector<8x8x12xbf16>
    %74 = vector.shape_cast %73 : vector<8x8x12xbf16> to vector<64x12xbf16>
    %c2 = arith.constant 2 : index
    %c0_39 = arith.constant 0 : index
    %c0_40 = arith.constant 0 : index
    %75 = vector.load %arg5[%c2, %c0_39, %c0_40] : memref<3x12x8xbf16, #tpu.memory_space<vmem>>, vector<1x12x8xbf16>
    %76 = vector.shape_cast %75 : vector<1x12x8xbf16> to vector<12x8xbf16>
    %cst_41 = arith.constant dense<0.000000e+00> : vector<64x8xf32>
    %77 = tpu.matmul %74, %76, %cst_41 {dimension_numbers = #tpu.dot_dimension_numbers<[1], [0], [0], [1], [0, 0, 1, 1], [], []>} : vector<64x12xbf16>, vector<12x8xbf16>, vector<64x8xf32> -> vector<64x8xf32>
    %78 = vector.shape_cast %77 : vector<64x8xf32> to vector<8x8x8xf32>
    %c0_42 = arith.constant 0 : index
    %c0_43 = arith.constant 0 : index
    %c0_44 = arith.constant 0 : index
    %79 = vector.load %arg6[%c0_42, %c0_43, %c0_44] : memref<8x8x8xf32, #tpu.memory_space<vmem>>, vector<8x8x8xf32>
    %80 = arith.addf %79, %78 : vector<8x8x8xf32>
    %c0_45 = arith.constant 0 : index
    %c0_46 = arith.constant 0 : index
    %c0_47 = arith.constant 0 : index
    %81 = vector.load %arg6[%c0_45, %c0_46, %c0_47] : memref<8x8x8xf32, #tpu.memory_space<vmem>>, vector<8x8x8xf32>
    tpu.vector_store %arg6[%c0_45, %c0_46, %c0_47], %80 {strides = array<i32>} : memref<8x8x8xf32, #tpu.memory_space<vmem>>, vector<8x8x8xf32>,
    return
  }
  func.func @transform_0(%arg0: i32, %arg1: i32) -> (i32, i32, i32, i32) {
    %c1_i32 = arith.constant 1 : i32
    %0 = arith.muli %arg0, %c1_i32 : i32
    %1 = arith.addi %0, %arg1 : i32
    %c0_i32 = arith.constant 0 : i32
    %c0_i32_0 = arith.constant 0 : i32
    %c0_i32_1 = arith.constant 0 : i32
    %c0_i32_2 = arith.constant 0 : i32
    return %1, %c0_i32, %c0_i32_0, %c0_i32_1 : i32, i32, i32, i32
  }
  func.func @transform_1(%arg0: i32, %arg1: i32) -> (i32, i32, i32, i32) {
    %c8_i32 = arith.constant 8 : i32
    %0 = arith.muli %arg0, %c8_i32 : i32
    %c8_i32_0 = arith.constant 8 : i32
    %1 = arith.muli %arg1, %c8_i32_0 : i32
    %c1_i32 = arith.constant 1 : i32
    %2 = arith.subi %1, %c1_i32 : i32
    %c0_i32 = arith.constant 0 : i32
    %3 = arith.maxsi %2, %c0_i32 : i32
    %4 = arith.addi %0, %3 : i32
    %c0_i32_1 = arith.constant 0 : i32
    %c0_i32_2 = arith.constant 0 : i32
    %c0_i32_3 = arith.constant 0 : i32
    %c0_i32_4 = arith.constant 0 : i32
    return %4, %c0_i32_1, %c0_i32_2, %c0_i32_3 : i32, i32, i32, i32
  }
  func.func @transform_2(%arg0: i32, %arg1: i32) -> (i32, i32, i32, i32) {
    %c8_i32 = arith.constant 8 : i32
    %0 = arith.muli %arg0, %c8_i32 : i32
    %c1_i32 = arith.constant 1 : i32
    %1 = arith.addi %arg1, %c1_i32 : i32
    %c8_i32_0 = arith.constant 8 : i32
    %2 = arith.muli %1, %c8_i32_0 : i32
    %c7_i32 = arith.constant 7 : i32
    %3 = arith.minsi %2, %c7_i32 : i32
    %4 = arith.addi %0, %3 : i32
    %c0_i32 = arith.constant 0 : i32
    %c0_i32_1 = arith.constant 0 : i32
    %c0_i32_2 = arith.constant 0 : i32
    %c0_i32_3 = arith.constant 0 : i32
    return %4, %c0_i32, %c0_i32_1, %c0_i32_2 : i32, i32, i32, i32
  }
  func.func @transform_3(%arg0: i32, %arg1: i32) -> (i32, i32, i32) {
    %c0_i32 = arith.constant 0 : i32
    %c0_i32_0 = arith.constant 0 : i32
    %c0_i32_1 = arith.constant 0 : i32
    %c0_i32_2 = arith.constant 0 : i32
    return %c0_i32, %c0_i32_0, %c0_i32_1 : i32, i32, i32
  }
  func.func @transform_4(%arg0: i32, %arg1: i32) -> (i32, i32, i32) {
    %c1_i32 = arith.constant 1 : i32
    %0 = arith.muli %arg0, %c1_i32 : i32
    %1 = arith.addi %0, %arg1 : i32
    %c0_i32 = arith.constant 0 : i32
    %c0_i32_0 = arith.constant 0 : i32
    %c0_i32_1 = arith.constant 0 : i32
    return %1, %c0_i32, %c0_i32_0 : i32, i32, i32
  }
}

</mosaic_0001>

<bundles_post_ra>
// kernel: _lambda_.1
= control target key start
LH: loop header
LB: loop body
LE: loop exit
PB: predicated region body
PF: predicated region fallthrough
CT: control target
= control target key end

     0   :  { %s1367_s15 = smov 0   ;;  %s1369_s16 = smov 0   ;;  %s1685_s0 = inlined_call_operand.vmem [shape: bf16[16,2,8,8], index: 0, kind: input, shape index: {}, may-alias: {0,1,2}]   ;;  %s1686_s1 = inlined_call_operand.vmem [shape: bf16[16,2,8,8], index: 1, kind: input, shape index: {}, may-alias: {0,1,2}]   ;;  %s1687_s2 = inlined_call_operand.vmem [shape: bf16[16,2,8,8], index: 2, kind: input, shape index: {}, may-alias: {0,1,2}]   ;;  %s1688_s3 = inlined_call_operand.vmem [shape: bf16[3,12,8], index: 3, kind: input, shape index: {}]   ;;  %s1689_s4 = inlined_call_operand.vmem [shape: f32[16,8,8], index: 4, kind: output, shape index: {}]  }
   0x1   :  { %s1371_s17 = smov 0  }
   0x2 LB: > { %s26_s18 = sadd.s32 1, %s1332_s16  ;;  %p1149_p0 = scmp.ge.s32.totalorder %s1336_s17, 1  ;;  %s1336_s17 = sphi %s1371_s17, %s14_s17   ;;  %s1332_s16 = sphi %s1369_s16, %s1695_s16   ;;  %s1328_s15 = sphi %s1367_s15, %s1694_s15  }
   0x3   : > { %p28_p1 = scmp.ge.s32.totalorder %s26_s18, 2  ;;  %p250_p2 = scmp.lt.s32.totalorder %s1336_s17, 3 }
   0x5   : > { %s1697_s18 = smov (%p28_p1, %s26_s18), 0  ;;  %p251_p3 = pnand %p1149_p0, %p250_p2 }
   0x6   : > { %s1150_s19 = sshll.u32 (!%p251_p3), %s1328_s15, 3  ;;  %s1338_s6 = smov (!%p251_p3), 124  }
   0x7   : > { %254 = sbr.rel (%p251_p3) target bundleno = 481 (0x1e1), region = 36  ;;  %p303_p4 = scmp.lt.s32.totalorder (!%p251_p3), %s1150_s19, 15 }
   0x8   : > { %s332_s20 = sadd.s32 (!%p251_p3), 7, %s1150_s19  ;;  %s1340_s7 = smov (!%p251_p3), 4  }
   0x9   : > { %p333_p5 = scmp.lt.s32.totalorder (!%p251_p3), %s332_s20, 15  ;;  %s1341_s8 = smov (!%p251_p3), 8  }
   0xc   : > { %s1699_s19 = smov (!%p303_p4, %s1150_s19), 15  ;;  %s1701_s20 = smov (!%p333_p5, %s332_s20), 15  ;;  %vm458_vm0 = vcmask 27648   ;;  %vm701_vm1 = vcmask 1043456   ;;  %vm702_vm2 = vsmask.f32 3328 }
   0xd   : > { %s1387_s21 = sshll.u32 %s1699_s19, 3  ;;  %s1193_s28 = sshll.u32 %s1701_s20, 3  ;;  %vm1432_vm3 = vmand %vm701_vm1, %vm702_vm2  ;;  %vm836_vm4 = vcmask 1045504   ;;  %vm658_vm5 = vcmask 1040384   ;;  %vm659_vm6 = vsmask.f32 256 }
   0xe   : > { %s1393_s24 = scalar_lea.vmem %s1685_s0, %s1387_s21  ;;  %s320_s27 = scalar_lea.vmem %s1686_s1, %s1387_s21  ;;  %vm1536_vm7 = vmand %vm658_vm5, %vm659_vm6  ;;  %vm754_vm8 = vcmask 31744   ;;  %vm779_vm9 = vcmask 64512   ;;  %vm823_vm10 = vcmask 97280  }
   0xf   : > { %v1257_v0 = vld [vmem:[%s1393_s24 + $0x8] sm:$0xff]   ;;  %v1258_v1 = vld [vmem:[%s1393_s24 + $0x10] sm:$0xff]   ;;  %v1259_v2 = vld [vmem:[%s1393_s24 + $0x18] sm:$0xff]   ;;  %s337_s5 = scalar_lea.vmem %s1687_s2, %s1193_s28 }
  0x10   : > { %v1203_v3 = vunpack.c.l.bf16 %v1257_v0  ;;  %v1204_v4 = vunpack.c.h.bf16 %v1257_v0  ;;  %v1207_v5 = vunpack.c.l.bf16 %v1258_v1  ;;  %v1208_v6 = vunpack.c.h.bf16 %v1258_v1  ;;  %v1260_v7 = vld [vmem:[%s1393_s24 + $0x20] sm:$0xff]   ;;  %v1261_v22 = vld [vmem:[%s1393_s24 + $0x28] sm:$0xff]   ;;  %v1262_v29 = vld [vmem:[%s1393_s24 + $0x30] sm:$0xff]  }
  0x11   : > { %v1230_v8 = vld [vmem:[%s320_s27] sm:$0xff]   ;;  %v1211_v10 = vunpack.c.l.bf16 %v1259_v2  ;;  %v1212_v11 = vunpack.c.h.bf16 %v1259_v2  ;;  %v1215_v12 = vunpack.c.l.bf16 %v1260_v7  ;;  %v1216_v13 = vunpack.c.h.bf16 %v1260_v7  ;;  %v1263_v33 = vld [vmem:[%s1393_s24 + $0x38] sm:$0xff]   ;;  %s1610_s27 = scalar_lea.vmem %s1689_s4, %s1387_s21 }
  0x12   : > { %v1198_v9 = vld [vmem:[%s1393_s24] sm:$0xff]   ;;  %v386_v14 = vadd.f32 %v1204_v4, %v1203_v3  ;;  %v387_v15 = vadd.f32 %v1208_v6, %v1207_v5  ;;  %v1231_v16 = vunpack.c.l.bf16 %v1230_v8  ;;  %v1232_v17 = vunpack.c.h.bf16 %v1230_v8 }
  0x13   : > { %v388_v18 = vadd.f32 %v1212_v11, %v1211_v10  ;;  %v389_v19 = vadd.f32 %v1216_v13, %v1215_v12  ;;  %v1199_v20 = vunpack.c.l.bf16 %v1198_v9  ;;  %v1200_v21 = vunpack.c.h.bf16 %v1198_v9  ;;  %v1234_v39 = vld [vmem:[%s337_s5] sm:$0xff]  }
  0x14   : > { %v394_v23 = vpack.c.bf16 %v386_v14, %v386_v14  ;;  %v395_v24 = vpack.c.bf16 %v387_v15, %v387_v15  ;;  %v497_v25 = vadd.f32 %v1232_v17, %v1231_v16  ;;  %v1219_v34 = vunpack.c.l.bf16 %v1261_v22 }
  0x15   : > { %v396_v26 = vpack.c.bf16 %v388_v18, %v388_v18  ;;  %v397_v27 = vpack.c.bf16 %v389_v19, %v389_v19  ;;  %v385_v28 = vadd.f32 %v1200_v21, %v1199_v20  ;;  %v1220_v37 = vunpack.c.h.bf16 %v1261_v22 }
  0x16   : > { %v402_v30 = vunpack.c.l.bf16 %v394_v23  ;;  %v403_v31 = vunpack.c.l.bf16 %v395_v24  ;;  %v498_v32 = vpack.c.bf16 %v497_v25, %v497_v25  ;;  %v1223_v38 = vunpack.c.l.bf16 %v1262_v29 }
  0x17   : > { %v1227_v40 = vunpack.c.l.bf16 %v1263_v33  ;;  %v1228_v41 = vunpack.c.h.bf16 %v1263_v33  ;;  %v1224_v42 = vunpack.c.h.bf16 %v1262_v29  ;;  %v1411_v43 = vunpack.c.l.bf16 %v396_v26 }
  0x18   : > { %v1299_v35 = vpack.i.bf16 %v403_v31, %v402_v30  ;;  %v499_v36 = vunpack.c.l.bf16 %v498_v32  ;;  %v405_v44 = vunpack.c.l.bf16 %v397_v27  ;;  %v393_v45 = vpack.c.bf16 %v385_v28, %v385_v28 }
  0x19   : > { %v390_v46 = vadd.f32 %v1220_v37, %v1219_v34  ;;  %v391_v47 = vadd.f32 %v1224_v42, %v1223_v38  ;;  %v1235_v48 = vunpack.c.l.bf16 %v1234_v39  ;;  %v1236_v49 = vunpack.c.h.bf16 %v1234_v39 }
  0x1a   : > { %1300 = vrot.lane.b32.xlu0 %v1299_v35, %s1338_s6  ;;  %501 = vrot.lane.b32.xlu1 %v499_v36, %s1338_s6  ;;  %v1304_v52 = vpack.i.bf16 %v405_v44, %v1411_v43  ;;  %v401_v53 = vunpack.c.l.bf16 %v393_v45  ;;  %v392_v54 = vadd.f32 %v1228_v41, %v1227_v40  ;;  %v1339_v13 = vmov 0.0  }
  0x1b   : > { %v398_v50 = vpack.c.bf16 %v390_v46, %v390_v46  ;;  %v399_v51 = vpack.c.bf16 %v391_v47, %v391_v47  ;;  %v519_v57 = vadd.f32 %v1236_v49, %v1235_v48  ;;  %v511_v14 = vunpack.c.l.bf16 %v1339_v13 }
  0x1c   : > { %v400_v59 = vpack.c.bf16 %v392_v54, %v392_v54 }
  0x1d   : > { %v406_v55 = vunpack.c.l.bf16 %v398_v50  ;;  %v407_v56 = vunpack.c.l.bf16 %v399_v51  ;;  %v520_v60 = vpack.c.bf16 %v519_v57, %v519_v57 }
  0x1e   : > { %v408_v61 = vunpack.c.l.bf16 %v400_v59 }
  0x1f   : > { %v1309_v58 = vpack.i.bf16 %v407_v56, %v406_v55  ;;  %v521_v62 = vunpack.c.l.bf16 %v520_v60 }
  0x21   : > { %1310 = vrot.lane.b32.xlu2 %v1309_v58, %s1338_s6 }
  0x22   : > { %1305 = vrot.lane.b32.xlu0 %v1304_v52, %s1338_s6  ;;  %417 = vrot.lane.b32.xlu1 %v401_v53, %s1338_s6 }
  0x29   : > { %523 = vrot.lane.b32.xlu2 %v521_v62, %s1338_s6 }
  0x2a   : > { %431 = vrot.lane.b32.xlu0 %v408_v61, %s1338_s6 }
  0x7b   : > { %v1311_v63 = vpop.permute.xlu2 %1310 }
  0x7c   : > { %v1313_v0 = vunpack.i.h.bf16 %v1311_v63  ;;  %v1312_v1 = vunpack.i.l.bf16 %v1311_v63 }
  0x7e   : > { %v447_v2 = vadd.f32 %v1313_v0, %v407_v56  ;;  %v446_v3 = vadd.f32 %v1312_v1, %v406_v55  ;;  %v1173_v56 = vld [vmem:[%s1688_s3 + $0x8] sm:$0xf] }
  0x80   : > { %v455_v4 = vpack.c.bf16 %v447_v2, %v447_v2  ;;  %v454_v5 = vpack.c.bf16 %v446_v3, %v446_v3 }
  0x82   : > { %465 = vst.msk [vmem:[#allocation2 + $0x1c] sm:$0xf] %vm458_vm0, %v455_v4 }
  0x83   : > { %464 = vst.msk [vmem:[#allocation2 + $0x18] sm:$0xf] %vm458_vm0, %v454_v5  ;;  %v524_v16 = vpop.permute.xlu2 %523 }
  0x84   : > { %v526_v20 = vadd.f32 %v524_v16, %v521_v62 }
  0x86   : > { %v527_v22 = vpack.c.bf16 %v526_v20, %v526_v20 }
  0x88   : > { %v532_v29 = vunpack.c.l.bf16 %v527_v22 }
  0x8a   : > { %v534_v33 = vmul.f32 %v532_v29, %v511_v14 }
  0x8c   : > { %v1301_v6 = vpop.permute.xlu0 %1300  ;;  %v502_v7 = vpop.permute.xlu1 %501 }
  0x8d   : > { %v1303_v8 = vunpack.i.h.bf16 %v1301_v6  ;;  %v1302_v9 = vunpack.i.l.bf16 %v1301_v6  ;;  %v504_v10 = vadd.f32 %v502_v7, %v499_v36  ;;  %v535_v36 = vpack.c.bf16 %v534_v33, %v534_v33 }
  0x8f   : > { %v443_v11 = vadd.f32 %v1303_v8, %v403_v31  ;;  %v442_v12 = vadd.f32 %v1302_v9, %v402_v30  ;;  %v505_v15 = vpack.c.bf16 %v504_v10, %v504_v10  ;;  %537 = vst.msk [vmem:[#allocation2 + $0x24] sm:$0xf] %vm458_vm0, %v535_v36 }
  0x91   : > { %v451_v17 = vpack.c.bf16 %v443_v11, %v443_v11  ;;  %v450_v18 = vpack.c.bf16 %v442_v12, %v442_v12  ;;  %v510_v19 = vunpack.c.l.bf16 %v505_v15 }
  0x93   : > { %461 = vst.msk [vmem:[#allocation2 + $0xc] sm:$0xf] %vm458_vm0, %v451_v17  ;;  %v512_v21 = vmul.f32 %v511_v14, %v510_v19 }
  0x94   : > { %460 = vst.msk [vmem:[#allocation2 + $0x8] sm:$0xf] %vm458_vm0, %v450_v18  ;;  %v1306_v23 = vpop.permute.xlu0 %1305  ;;  %v418_v24 = vpop.permute.xlu1 %417 }
  0x95   : > { %v1308_v25 = vunpack.i.h.bf16 %v1306_v23  ;;  %v1307_v26 = vunpack.i.l.bf16 %v1306_v23  ;;  %v513_v27 = vpack.c.bf16 %v512_v21, %v512_v21  ;;  %v441_v28 = vadd.f32 %v418_v24, %v401_v53 }
  0x97   : > { %v445_v30 = vadd.f32 %v1308_v25, %v405_v44  ;;  %v444_v31 = vadd.f32 %v1307_v26, %v1411_v43  ;;  %514 = vst.msk [vmem:[#allocation2] sm:$0xf] %vm458_vm0, %v513_v27  ;;  %v449_v32 = vpack.c.bf16 %v441_v28, %v441_v28  ;;  %v1266_v44 = vld [vmem:[#allocation2 + $0x18] sm:$0xff]  }
  0x98   : > { %v1252_v46 = vunpack.c.h.b16 %v1266_v44  ;;  %v1251_v59 = vunpack.c.l.b16 %v1266_v44 }
  0x99   : > { %v453_v34 = vpack.c.bf16 %v445_v30, %v445_v30  ;;  %v452_v35 = vpack.c.bf16 %v444_v31, %v444_v31  ;;  %459 = vst.msk [vmem:[#allocation2 + $0x4] sm:$0xf] %vm458_vm0, %v449_v32 }
  0x9a   : > { %v1438_v60 = vpack.c.b16 %v1252_v46, %v1252_v46  ;;  %v1448_v8 = vpack.c.b16 %v1251_v59, %v1251_v59 }
  0x9b   : > { %463 = vst.msk [vmem:[#allocation2 + $0x14] sm:$0xf] %vm458_vm0, %v453_v34  ;;  %v1264_v37 = vld [vmem:[#allocation2 + $0x8] sm:$0xff]  }
  0x9c   : > { %462 = vst.msk [vmem:[#allocation2 + $0x10] sm:$0xf] %vm458_vm0, %v452_v35  ;;  %v1244_v38 = vunpack.c.h.b16 %v1264_v37  ;;  %v1243_v39 = vunpack.c.l.b16 %v1264_v37  ;;  %v432_v40 = vpop.permute.xlu0 %431  ;;  %v628_v9 = vshrl.u32 %v1438_v60, 16  ;;  %v621_v17 = vshrl.u32 %v1448_v8, 16 }
  0x9d   : > { %v448_v41 = vadd.f32 %v432_v40, %v408_v61  ;;  %v631_v40 = vshll.u32 %v1438_v60, 16 }
  0x9e   : > { %v571_v42 = vpack.c.b16 %v1244_v38, %v1244_v38  ;;  %v1424_v43 = vpack.c.b16 %v1243_v39, %v1243_v39  ;;  %v623_v23 = vrot.slane %v621_v17, 7  ;;  %v630_v24 = vrot.slane %v628_v9, 7 }
  0x9f   : > { %v456_v45 = vpack.c.bf16 %v448_v41, %v448_v41  ;;  %v624_v39 = vshll.u32 %v1448_v8, 16 }
  0xa0   : > { %720 = vrot.lane.b32.xlu2 %v571_v42, %s1340_s7  ;;  %718 = vrot.lane.b32.xlu1 %v1424_v43, %s1340_s7  ;;  %v596_v47 = vshll.u32 %v1424_v43, 16  ;;  %v603_v48 = vshll.u32 %v571_v42, 16  ;;  %v1238_v49 = vld [vmem:[#allocation2] sm:$0xff]   ;;  %v593_v52 = vshrl.u32 %v1424_v43, 16  ;;  %v600_v54 = vshrl.u32 %v571_v42, 16 }
  0xa1   : > { %466 = vst.msk [vmem:[#allocation2 + $0x20] sm:$0xf] %vm458_vm0, %v456_v45  ;;  %v1239_v50 = vunpack.c.l.b16 %v1238_v49  ;;  %v1240_v51 = vunpack.c.h.b16 %v1238_v49  ;;  %v1480_v45 = vor.u32 %v624_v39, %v623_v23 }
  0xa2   : > { %v675_v53 = vrot.slane %v596_v47, 1  ;;  %v677_v55 = vrot.slane %v603_v48, 1  ;;  %v602_v6 = vrot.slane %v600_v54, 7  ;;  %v595_v14 = vrot.slane %v593_v52, 7 }
  0xa3   : > { %v1265_v57 = vld [vmem:[#allocation2 + $0x10] sm:$0xff]   ;;  %v1436_v58 = vpack.c.b16 %v1239_v50, %v1239_v50  ;;  %v1440_v1 = vpack.c.b16 %v1240_v51, %v1240_v51  ;;  %v683_v51 = vrot.slane %v624_v39, 1 }
  0xa4   : > { %v676_v61 = vor.u32 %v675_v53, %v593_v52  ;;  %v1247_v62 = vunpack.c.l.b16 %v1265_v57  ;;  %v1248_v63 = vunpack.c.h.b16 %v1265_v57  ;;  %v678_v0 = vor.u32 %v677_v55, %v600_v54 }
  0xa5   : > { %v582_v7 = vshll.u32 %v1436_v58, 16  ;;  %v579_v15 = vshrl.u32 %v1436_v58, 16  ;;  %v586_v16 = vshrl.u32 %v1440_v1, 16  ;;  %v1458_v29 = vor.u32 %v603_v48, %v602_v6 }
  0xa6   : > { %v706_v2 = vsel %vm1432_vm3, %v676_v61, 0  ;;  %v572_v3 = vpack.c.b16 %v1247_v62, %v1247_v62  ;;  %v573_v4 = vpack.c.b16 %v1248_v63, %v1248_v63  ;;  %v707_v5 = vsel %vm1432_vm3, %v678_v0, 0 }
  0xa7   : > { %742 = vrot.lane.b32.xlu0 %v706_v2, %s1341_s8  ;;  %v671_v22 = vrot.slane %v582_v7, 1  ;;  %v581_v30 = vrot.slane %v579_v15, 7  ;;  %v588_v31 = vrot.slane %v586_v16, 7  ;;  %v1462_v33 = vor.u32 %v596_v47, %v595_v14  ;;  %v1183_v14 = vld [vmem:[%s1688_s3 + $0x10] sm:$0xf] }
  0xa8   : > { %722 = vrot.lane.b32.xlu2 %v572_v3, %s1340_s7  ;;  %744 = vrot.lane.b32.xlu1 %v707_v5, %s1341_s8  ;;  %v607_v10 = vshrl.u32 %v572_v3, 16  ;;  %v610_v11 = vshll.u32 %v572_v3, 16  ;;  %v614_v12 = vshrl.u32 %v573_v4, 16  ;;  %v617_v13 = vshll.u32 %v573_v4, 16  ;;  %v1267_v25 = vld [vmem:[#allocation2 + $0x20] sm:$0xff]  }
  0xa9   : > { %v1256_v28 = vunpack.c.h.b16 %v1267_v25  ;;  %v1255_v36 = vunpack.c.l.b16 %v1267_v25  ;;  %v589_v38 = vshll.u32 %v1440_v1, 16  ;;  %v672_v42 = vor.u32 %v671_v22, %v579_v15 }
  0xaa   : > { %v609_v18 = vrot.slane %v607_v10, 7  ;;  %v679_v19 = vrot.slane %v610_v11, 1  ;;  %v681_v20 = vrot.slane %v617_v13, 1  ;;  %v616_v21 = vrot.slane %v614_v12, 7 }
  0xab   : > { %v577_v37 = vpack.c.b16 %v1256_v28, %v1256_v28  ;;  %v1476_v43 = vor.u32 %v582_v7, %v581_v30  ;;  %v1478_v44 = vor.u32 %v589_v38, %v588_v31  ;;  %v576_v46 = vpack.c.b16 %v1255_v36, %v1255_v36 }
  0xac   : > { %v680_v26 = vor.u32 %v679_v19, %v607_v10  ;;  %v682_v27 = vor.u32 %v681_v20, %v614_v12  ;;  %v1460_v32 = vor.u32 %v610_v11, %v609_v18  ;;  %v1474_v41 = vor.u32 %v617_v13, %v616_v21  ;;  %v1194_v10 = vld [vmem:[%s1688_s3] sm:$0x30]  ;;  %v1195_v13 = vld [vmem:[%s1688_s3 + $0x8] sm:$0x30] }
  0xad   : > { %v642_v47 = vshrl.u32 %v577_v37, 16  ;;  %v1482_v48 = vor.u32 %v631_v40, %v630_v24  ;;  %v635_v49 = vshrl.u32 %v576_v46, 16  ;;  %v704_v50 = vsel %vm1432_vm3, %v672_v42, 0 }
  0xae   : > { %v708_v34 = vsel %vm1432_vm3, %v680_v26, 0  ;;  %v709_v35 = vsel %vm1432_vm3, %v682_v27, 0  ;;  %v673_v52 = vrot.slane %v589_v38, 1  ;;  %v638_v55 = vshll.u32 %v576_v46, 16 }
  0xaf   : > { %746 = vrot.lane.b32.xlu0 %v708_v34, %s1341_s8  ;;  %v637_v53 = vrot.slane %v635_v49, 7  ;;  %v644_v54 = vrot.slane %v642_v47, 7  ;;  %v645_v57 = vshll.u32 %v577_v37, 16  ;;  %v684_v59 = vor.u32 %v683_v51, %v621_v17 }
  0xb0   : > { %748 = vrot.lane.b32.xlu2 %v709_v35, %s1341_s8  ;;  %724 = vrot.lane.b32.xlu1 %v573_v4, %s1340_s7  ;;  %v674_v61 = vor.u32 %v673_v52, %v586_v16  ;;  %v687_v3 = vrot.slane %v638_v55, 1  ;;  %v1174_v15 = vor.u32 %v1195_v13, %v1173_v56  ;;  %v1196_v16 = vld [vmem:[%s1688_s3 + $0x10] sm:$0x30]  ;;  %v663_v24 = vsel %vm1536_vm7, 0, %v1462_v33 }
  0xb1   : > { %v1491_v62 = vor.u32 %v638_v55, %v637_v53  ;;  %v1493_v63 = vor.u32 %v645_v57, %v644_v54  ;;  %v710_v0 = vsel %vm1432_vm3, %v684_v59, 0  ;;  %v689_v4 = vrot.slane %v645_v57, 1 }
  0xb2   : > { %v705_v2 = vsel %vm1432_vm3, %v674_v61, 0  ;;  %v688_v6 = vor.u32 %v687_v3, %v635_v49  ;;  %v1184_v17 = vor.u32 %v1196_v16, %v1183_v14  ;;  %v914_v18 = vsel %vm836_vm4, %v1174_v15, 0 }
  0xb3   : > { %v690_v7 = vor.u32 %v689_v4, %v642_v47  ;;  %1269 = vmatpush.bf16.msra.mxu1 %v914_v18  ;;  %v664_v25 = vsel %vm1536_vm7, 0, %v1458_v29  ;;  %v665_v29 = vsel %vm1536_vm7, 0, %v1460_v32  ;;  %v666_v42 = vsel %vm1536_vm7, 0, %v1474_v41 }
  0xb4   : > { %v994_v20 = vsel %vm836_vm4, %v1184_v17, 0  ;;  %v661_v41 = vsel %vm1536_vm7, 0, %v1476_v43  ;;  %v662_v61 = vsel %vm1536_vm7, 0, %v1478_v44  ;;  %v667_v43 = vsel %vm1536_vm7, 0, %v1480_v45 }
  0xb5   : > { %1270 = vmatpush.bf16.msra.mxu2 %v994_v20  ;;  %v669_v16 = vsel %vm1536_vm7, 0, %v1491_v62 }
  0xb7   : > { %714 = vrot.lane.b32.xlu0 %v1436_v58, %s1340_s7  ;;  %v685_v58 = vrot.slane %v631_v40, 1 }
  0xb8   : > { %716 = vrot.lane.b32.xlu1 %v1440_v1, %s1340_s7  ;;  %738 = vrot.lane.b32.xlu2 %v704_v50, %s1341_s8 }
  0xb9   : > { %v686_v1 = vor.u32 %v685_v58, %v628_v9  ;;  %v713_v9 = vsel %vm1432_vm3, %v690_v7, 0 }
  0xbb   : > { %v711_v5 = vsel %vm1432_vm3, %v686_v1, 0 }
  0xbf   : > { %740 = vrot.lane.b32.xlu0 %v705_v2, %s1341_s8 }
  0xc0   : > { %726 = vrot.lane.b32.xlu1 %v1448_v8, %s1340_s7  ;;  %750 = vrot.lane.b32.xlu2 %v710_v0, %s1341_s8  ;;  %v712_v8 = vsel %vm1432_vm3, %v688_v6, 0 }
  0xc7   : > { %728 = vrot.lane.b32.xlu0 %v1438_v60, %s1340_s7  ;;  %v1163_v60 = vld [vmem:[%s1688_s3] sm:$0xf] }
  0xc8   : > { %752 = vrot.lane.b32.xlu1 %v711_v5, %s1341_s8  ;;  %877 = vrot.lane.b32.xlu2 %v576_v46, %s1340_s7  ;;  %v1164_v11 = vor.u32 %v1194_v10, %v1163_v60  ;;  %v668_v10 = vsel %vm1536_vm7, 0, %v1482_v48 }
  0xca   : > { %v838_v12 = vsel %vm836_vm4, %v1164_v11, 0 }
  0xcb   : > { %1268 = vmatpush.bf16.msra.mxu3 %v838_v12  ;;  %847 = vmatpush.bf16.msra.mxu0 %v838_v12 }
  0xcf   : > { %880 = vrot.lane.b32.xlu0 %v712_v8, %s1341_s8  ;;  %923 = vmatpush.bf16.msrb.mxu0 %v914_v18 }
  0xd0   : > { %969 = vrot.lane.b32.xlu1 %v577_v37, %s1340_s7  ;;  %972 = vrot.lane.b32.xlu2 %v713_v9, %s1341_s8 }
  0xfa   : > { %v721_v19 = vpop.permute.xlu2 %720 }
  0xfb   : > { %v766_v28 = vsel %vm754_vm8, %v664_v25, %v721_v19  ;;  %v670_v19 = vsel %vm1536_vm7, 0, %v1493_v63 }
 0x102   : > { %v723_v22 = vpop.permute.xlu2 %722 }
 0x103   : > { %v769_v33 = vsel %vm754_vm8, %v665_v29, %v723_v22 }
 0x10a   : > { %v749_v37 = vpop.permute.xlu2 %748 }
 0x112   : > { %v719_v21 = vpop.permute.xlu1 %718  ;;  %v739_v52 = vpop.permute.xlu2 %738 }
 0x113   : > { %v763_v26 = vsel %vm754_vm8, %v663_v24, %v719_v21 }
 0x119   : > { %v743_v27 = vpop.permute.xlu0 %742 }
 0x11a   : > { %v785_v30 = vsel %vm779_vm9, %v763_v26, %v743_v27  ;;  %v745_v31 = vpop.permute.xlu1 %744  ;;  %v751_v0 = vpop.permute.xlu2 %750 }
 0x11b   : > { %v808_v34 = vunpack.c.l.b16 %v785_v30  ;;  %v787_v35 = vsel %vm779_vm9, %v766_v28, %v745_v31 }
 0x11c   : > { %v809_v36 = vunpack.c.l.b16 %v787_v35 }
 0x11e   : > { %v1550_v38 = vpack.c.b16 %v809_v36, %v808_v34 }
 0x120   : > { %1166 = vmatmul.msk.bf16.vlgmr.msra.gmra.mxu3 %vm823_vm10, %v1550_v38 }
 0x121   : > { %v747_v39 = vpop.permute.xlu0 %746 }
 0x122   : > { %v789_v40 = vsel %vm779_vm9, %v769_v33, %v747_v39  ;;  %v725_v46 = vpop.permute.xlu1 %724  ;;  %v878_v56 = vpop.permute.xlu2 %877 }
 0x123   : > { %v810_v47 = vunpack.c.l.b16 %v789_v40  ;;  %v772_v49 = vsel %vm754_vm8, %v666_v42, %v725_v46  ;;  %v884_v48 = vsel %vm754_vm8, %v669_v16, %v878_v56 }
 0x124   : > { %v791_v50 = vsel %vm779_vm9, %v772_v49, %v749_v37 }
 0x125   : > { %v811_v51 = vunpack.c.l.b16 %v791_v50  ;;  %v893_v32 = vpack.c.b16 %v810_v47, %v809_v36 }
 0x127   : > { %1176 = vmatmul.msk.bf16.vlgmr.msra.gmra.mxu1 %vm823_vm10, %v893_v32  ;;  %v816_v53 = vpack.c.b16 %v811_v51, %v810_v47 }
 0x129   : > { %v715_v54 = vpop.permute.xlu0 %714  ;;  %1186 = vmatmul.msk.bf16.vlgmr.msra.gmra.mxu2 %vm823_vm10, %v816_v53 }
 0x12a   : > { %v717_v55 = vpop.permute.xlu1 %716  ;;  %v757_v57 = vsel %vm754_vm8, %v661_v41, %v715_v54  ;;  %v973_v21 = vpop.permute.xlu2 %972 }
 0x12b   : > { %v781_v59 = vsel %vm779_vm9, %v757_v57, %v739_v52  ;;  %v760_v2 = vsel %vm754_vm8, %v662_v61, %v717_v55 }
 0x12c   : > { %v806_v4 = vunpack.c.l.b16 %v781_v59 }
 0x130   : > { %1167 = vmatmul.msk.bf16.gmra.mxu3 %vm823_vm10, %v816_v53 }
 0x131   : > { %v741_v58 = vpop.permute.xlu0 %740 }
 0x132   : > { %v783_v1 = vsel %vm779_vm9, %v760_v2, %v741_v58  ;;  %v727_v3 = vpop.permute.xlu1 %726 }
 0x133   : > { %v807_v5 = vunpack.c.l.b16 %v783_v1  ;;  %v775_v6 = vsel %vm754_vm8, %v667_v43, %v727_v3 }
 0x134   : > { %v793_v7 = vsel %vm779_vm9, %v775_v6, %v751_v0 }
 0x135   : > { %v892_v44 = vpack.c.b16 %v808_v34, %v807_v5  ;;  %v812_v8 = vunpack.c.l.b16 %v793_v7  ;;  %v814_v9 = vpack.c.b16 %v807_v5, %v806_v4 }
 0x137   : > { %1165 = vmatmul.msk.bf16.vlgmr.msra.gmra.mxu0 %vm823_vm10, %v814_v9  ;;  %v894_v60 = vpack.c.b16 %v812_v8, %v811_v51 }
 0x138   : > { %1003 = vmatpush.bf16.msra.mxu0 %v994_v20 }
 0x139   : > { %v729_v11 = vpop.permute.xlu0 %728  ;;  %1177 = vmatmul.msk.bf16.gmra.mxu1 %vm823_vm10, %v894_v60 }
 0x13a   : > { %v778_v45 = vsel %vm754_vm8, %v668_v10, %v729_v11  ;;  %v753_v12 = vpop.permute.xlu1 %752 }
 0x13b   : > { %v795_v13 = vsel %vm779_vm9, %v778_v45, %v753_v12 }
 0x13c   : > { %v813_v14 = vunpack.c.l.b16 %v795_v13 }
 0x13e   : > { %v817_v15 = vpack.c.b16 %v813_v14, %v812_v8 }
 0x140   : > { %1168 = vmatmul.msk.bf16.gmra.mxu3 %vm823_vm10, %v817_v15  ;;  %1187 = vmatmul.msk.bf16.gmra.mxu2 %vm823_vm10, %v817_v15 }
 0x141   : > { %v881_v17 = vpop.permute.xlu0 %880 }
 0x142   : > { %v886_v18 = vsel %vm779_vm9, %v884_v48, %v881_v17  ;;  %v970_v20 = vpop.permute.xlu1 %969 }
 0x143   : > { %v891_v22 = vunpack.c.l.b16 %v886_v18  ;;  %v976_v24 = vsel %vm754_vm8, %v670_v19, %v970_v20 }
 0x144   : > { %v978_v62 = vsel %vm779_vm9, %v976_v24, %v973_v21 }
 0x145   : > { %v983_v25 = vunpack.c.l.b16 %v978_v62  ;;  %v895_v26 = vpack.c.b16 %v891_v22, %v813_v14 }
 0x147   : > { %1175 = vmatmul.msk.bf16.vlgmr.msrb.gmra.mxu0 %vm823_vm10, %v892_v44  ;;  %v984_v27 = vpack.c.b16 %v983_v25, %v891_v22 }
 0x149   : > { %1178 = vmatmul.msk.bf16.gmra.mxu1 %vm823_vm10, %v895_v26 }
 0x150   : > { %1188 = vmatmul.msk.bf16.gmra.mxu2 %vm823_vm10, %v984_v27 }
 0x157   : > { %1185 = vmatmul.msk.bf16.vlgmr.msra.gmra.mxu0 %vm823_vm10, %v1550_v38 }
 0x1a3   : > { %v854_v63 = vpop.f32.mrf.mxu3 }
 0x1a4   : > { %871 = vst.msk [vmem:[%s1610_s27 + $0x10] sm:$0xff] %vm779_vm9, %v854_v63  ;;  %v930_v23 = vpop.f32.mrf.mxu1 }
 0x1ab   : > { %v947_v28 = vld [vmem:[%s1610_s27 + $0x10] sm:$0xff]  ;;  %v856_v30 = vpop.f32.mrf.mxu3 }
 0x1ac   : > { %v955_v31 = vadd.f32 %v947_v28, %v930_v23  ;;  %872 = vst.msk [vmem:[%s1610_s27 + $0x18] sm:$0xff] %vm779_vm9, %v856_v30  ;;  %v932_v34 = vpop.f32.mrf.mxu1  ;;  %v1010_v35 = vpop.f32.mrf.mxu2 }
 0x1ae   : > { %963 = vst.msk [vmem:[%s1610_s27 + $0x10] sm:$0xff] %vm779_vm9, %v955_v31 }
 0x1b3   : > { %v948_v36 = vld [vmem:[%s1610_s27 + $0x18] sm:$0xff]  ;;  %v859_v37 = vpop.f32.mrf.mxu3 }
 0x1b4   : > { %v956_v38 = vadd.f32 %v948_v36, %v932_v34  ;;  %873 = vst.msk [vmem:[%s1610_s27 + $0x20] sm:$0xff] %vm779_vm9, %v859_v37  ;;  %v849_v29 = vpop.f32.mrf.mxu0  ;;  %v1012_v42 = vpop.f32.mrf.mxu2 }
 0x1b5   : > { %v1027_v33 = vld [vmem:[%s1610_s27 + $0x10] sm:$0xff]  ;;  %869 = vst.msk [vmem:[%s1610_s27] sm:$0xff] %vm779_vm9, %v849_v29 }
 0x1b6   : > { %964 = vst.msk [vmem:[%s1610_s27 + $0x18] sm:$0xff] %vm779_vm9, %v956_v38  ;;  %v1035_v39 = vadd.f32 %v1027_v33, %v1010_v35  ;;  %v935_v40 = vpop.f32.mrf.mxu1 }
 0x1b8   : > { %1043 = vst.msk [vmem:[%s1610_s27 + $0x10] sm:$0xff] %vm779_vm9, %v1035_v39 }
 0x1bb   : > { %v949_v46 = vld [vmem:[%s1610_s27 + $0x20] sm:$0xff]  ;;  %v861_v47 = vpop.f32.mrf.mxu3 }
 0x1bc   : > { %v957_v49 = vadd.f32 %v949_v46, %v935_v40  ;;  %874 = vst.msk [vmem:[%s1610_s27 + $0x28] sm:$0xff] %vm779_vm9, %v861_v47  ;;  %v851_v50 = vpop.f32.mrf.mxu0  ;;  %v945_v59 = vld [vmem:[%s1610_s27] sm:$0xff] }
 0x1bd   : > { %v1028_v51 = vld [vmem:[%s1610_s27 + $0x18] sm:$0xff]  ;;  %870 = vst.msk [vmem:[%s1610_s27 + $0x8] sm:$0xff] %vm779_vm9, %v851_v50 }
 0x1be   : > { %v1036_v32 = vadd.f32 %v1028_v51, %v1012_v42  ;;  %965 = vst.msk [vmem:[%s1610_s27 + $0x20] sm:$0xff] %vm779_vm9, %v957_v49  ;;  %v937_v52 = vpop.f32.mrf.mxu1 }
 0x1c0   : > { %1044 = vst.msk [vmem:[%s1610_s27 + $0x18] sm:$0xff] %vm779_vm9, %v1036_v32 }
 0x1c3   : > { %v950_v53 = vld [vmem:[%s1610_s27 + $0x28] sm:$0xff]  ;;  %v864_v54 = vpop.f32.mrf.mxu3  ;;  %v1015_v55 = vpop.f32.mrf.mxu2 }
 0x1c4   : > { %v958_v41 = vadd.f32 %v950_v53, %v937_v52  ;;  %875 = vst.msk [vmem:[%s1610_s27 + $0x30] sm:$0xff] %vm779_vm9, %v864_v54  ;;  %v925_v57 = vpop.f32.mrf.mxu0  ;;  %v946_v6 = vld [vmem:[%s1610_s27 + $0x8] sm:$0xff] }
 0x1c5   : > { %v1029_v61 = vld [vmem:[%s1610_s27 + $0x20] sm:$0xff]  ;;  %v953_v0 = vadd.f32 %v945_v59, %v925_v57 }
 0x1c6   : > { %966 = vst.msk [vmem:[%s1610_s27 + $0x28] sm:$0xff] %vm779_vm9, %v958_v41  ;;  %v1037_v2 = vadd.f32 %v1029_v61, %v1015_v55  ;;  %v940_v58 = vpop.f32.mrf.mxu1 }
 0x1c7   : > { %961 = vst.msk [vmem:[%s1610_s27] sm:$0xff] %vm779_vm9, %v953_v0 }
 0x1c8   : > { %1045 = vst.msk [vmem:[%s1610_s27 + $0x20] sm:$0xff] %vm779_vm9, %v1037_v2 }
 0x1cb   : > { %v951_v1 = vld [vmem:[%s1610_s27 + $0x30] sm:$0xff]  ;;  %v866_v43 = vpop.f32.mrf.mxu3  ;;  %v1017_v3 = vpop.f32.mrf.mxu2 }
 0x1cc   : > { %v959_v4 = vadd.f32 %v951_v1, %v940_v58  ;;  %876 = vst.msk [vmem:[%s1610_s27 + $0x38] sm:$0xff] %vm779_vm9, %v866_v43  ;;  %v927_v5 = vpop.f32.mrf.mxu0 }
 0x1cd   : > { %v1030_v7 = vld [vmem:[%s1610_s27 + $0x28] sm:$0xff]  ;;  %v954_v44 = vadd.f32 %v946_v6, %v927_v5 }
 0x1ce   : > { %967 = vst.msk [vmem:[%s1610_s27 + $0x30] sm:$0xff] %vm779_vm9, %v959_v4  ;;  %v1038_v8 = vadd.f32 %v1030_v7, %v1017_v3  ;;  %v942_v9 = vpop.f32.mrf.mxu1  ;;  %v1025_v12 = vld [vmem:[%s1610_s27] sm:$0xff] }
 0x1cf   : > { %962 = vst.msk [vmem:[%s1610_s27 + $0x8] sm:$0xff] %vm779_vm9, %v954_v44 }
 0x1d0   : > { %1046 = vst.msk [vmem:[%s1610_s27 + $0x28] sm:$0xff] %vm779_vm9, %v1038_v8 }
 0x1d3   : > { %v952_v60 = vld [vmem:[%s1610_s27 + $0x38] sm:$0xff]  ;;  %v1020_v10 = vpop.f32.mrf.mxu2 }
 0x1d4   : > { %v960_v11 = vadd.f32 %v952_v60, %v942_v9  ;;  %v1005_v45 = vpop.f32.mrf.mxu0 }
 0x1d5   : > { %v1031_v56 = vld [vmem:[%s1610_s27 + $0x30] sm:$0xff]  ;;  %v1033_v13 = vadd.f32 %v1025_v12, %v1005_v45 }
 0x1d6   : > { %968 = vst.msk [vmem:[%s1610_s27 + $0x38] sm:$0xff] %vm779_vm9, %v960_v11  ;;  %v1039_v14 = vadd.f32 %v1031_v56, %v1020_v10  ;;  %v1026_v16 = vld [vmem:[%s1610_s27 + $0x8] sm:$0xff] }
 0x1d7   : > { %1041 = vst.msk [vmem:[%s1610_s27] sm:$0xff] %vm779_vm9, %v1033_v13 }
 0x1d8   : > { %1047 = vst.msk [vmem:[%s1610_s27 + $0x30] sm:$0xff] %vm779_vm9, %v1039_v14 }
 0x1db   : > { %v1022_v48 = vpop.f32.mrf.mxu2 }
 0x1dc   : > { %v1007_v15 = vpop.f32.mrf.mxu0 }
 0x1dd   : > { %v1032_v17 = vld [vmem:[%s1610_s27 + $0x38] sm:$0xff]  ;;  %v1034_v18 = vadd.f32 %v1026_v16, %v1007_v15 }
 0x1de   : > { %v1040_v19 = vadd.f32 %v1032_v17, %v1022_v48 }
 0x1df   : > { %1042 = vst.msk [vmem:[%s1610_s27 + $0x8] sm:$0xff] %vm779_vm9, %v1034_v18 }
 0x1e0   : > { %1048 = vst.msk [vmem:[%s1610_s27 + $0x38] sm:$0xff] %vm779_vm9, %v1040_v19 }
 0x1e1 PF: > { %s14_s17 = sadd.s32 1, %s1336_s17   ;;  %s1694_s15 = smov %s1332_s16 }
 0x1e2   : > { %p11_p6 = scmp.ge.s32.totalorder %s14_s17, 4   ;;  %s1695_s16 = smov %s1697_s18 }
 0x1e4   :  { %13 = sbr.rel (!%p11_p6) target bundleno = 2 (0x2), region = 76 }

</bundles_post_ra>
